<compile_context>
chip_gen: v5e
topology: v5e:2x2
jax: 0.10.0
libtpu: 0.0.40
codegen_flags: <defaults>
</compile_context>

<pallas_src>
import functools

import jax
import jax.numpy as jnp
import numpy as np
from jax.experimental import pallas as pl
from jax.experimental.pallas import tpu as pltpu


# ----------------------------- Pallas kernel ---------------------------------
def _make_kernel(b_blk):
    def masked_cconv_kernel(patch_ref, w_ref, scale_ref, bias_ref, out_ref):
        # patch_ref : (B_blk, KKC, P)  pruned im2col rows (nonzero mask taps only)
        # w_ref     : (Cout, KKC)      masked conv weight, resident across the grid
        # scale_ref : (N, Cout, 1)     resident: softplus(onehot @ Ws^T)
        # bias_ref  : (N, Cout, 1)     resident: scale*conv_bias + onehot @ Wb^T
        # out_ref   : (B_blk, Cout, P) lane-dense output (P on lanes)
        b0 = pl.program_id(0) * b_blk
        w = w_ref[...]
        for bb in range(b_blk):                     # static unroll, B_blk is small
            conv = jnp.dot(w, patch_ref[bb],
                           preferred_element_type=jnp.float32)      # (Cout, P)
            s = scale_ref[b0 + bb]                                   # (Cout, 1)
            t = bias_ref[b0 + bb]                                    # (Cout, 1)
            out_ref[bb] = (s * conv + t).astype(out_ref.dtype)
    return masked_cconv_kernel


# ------------------------------ helpers ---------------------------------------
def _pick_block(n, bytes_per_sample, max_blk=16):
    """Largest divisor of n that (a) keeps >=2 grid steps when n>=2 (v7x megacore),
    (b) keeps the double-buffered patches block small vs VMEM, (c) is <= max_blk."""
    cap = max(1, min(max_blk, (4 << 20) // max(1, bytes_per_sample)))
    if n >= 2:
        cap = min(cap, max(1, n // 2))
    for b in range(min(cap, n), 0, -1):
        if n % b == 0:
            return b
    return 1


# ------------------------------ JAX wrapper ------------------------------------
@functools.partial(jax.jit, static_argnames=("taps", "lmda_depth"))
def _masked_cconv_jit(x_nchw, weight_oihw, conv_bias, scale_w, bias_w, lmda_idx,
                      *, taps, lmda_depth):
    N, Cin, H, W = x_nchw.shape
    Cout, _, K, _ = weight_oihw.shape
    Ho, Wo = H - K + 1, W - K + 1
    P = Ho * Wo
    T = len(taps)               # nonzero mask taps (12 for the fixed causal mask)
    KKC = T * Cin               # pruned contraction dim (no padding, no jnp.pad)

    # --- pruned im2col: only nonzero mask taps, P on the last (lane) axis -------
    cols = [x_nchw[:, :, kh:kh + Ho, kw:kw + Wo] for (kh, kw, _) in taps]
    patches = jnp.stack(cols, axis=1).reshape(N, KKC, P)         # (N, T*Cin, P)

    # --- masked weight restricted to the same taps, same (tap, ci) row order ----
    w_rows = [weight_oihw[:, :, kh, kw] * jnp.float32(m) for (kh, kw, m) in taps]
    w_t = jnp.stack(w_rows, axis=1).reshape(Cout, KKC)           # (Cout, T*Cin)

    # --- lambda-conditioned scale / bias (tiny XLA ops; stable softplus) --------
    onehot = jax.nn.one_hot(lmda_idx[:, 0], lmda_depth, dtype=jnp.float32)  # (N, L)
    scale = jax.nn.softplus(onehot @ scale_w.T)                             # (N, Cout)
    lbias = onehot @ bias_w.T                                               # (N, Cout)
    # fold conv bias: scale*(conv + cb) + lbias == scale*conv + (scale*cb + lbias)
    total_bias = scale * conv_bias[None, :] + lbias                         # (N, Cout)
    scale3 = scale.reshape(N, Cout, 1)
    bias3 = total_bias.reshape(N, Cout, 1)

    b_blk = _pick_block(N, KKC * P * 4)
    grid = (N // b_blk,)

    cost = pl.CostEstimate(
        flops=2 * N * Cout * KKC * P,
        transcendentals=0,
        bytes_accessed=4 * (N * KKC * P + Cout * KKC + 2 * N * Cout + N * Cout * P),
    )

    out_t = pl.pallas_call(
        _make_kernel(b_blk),
        out_shape=jax.ShapeDtypeStruct((N, Cout, P), jnp.float32),
        grid_spec=pltpu.PrefetchScalarGridSpec(
            num_scalar_prefetch=0,
            grid=grid,
            in_specs=[
                pl.BlockSpec((b_blk, KKC, P), lambda b: (b, 0, 0)),   # patches
                pl.BlockSpec((Cout, KKC), lambda b: (0, 0)),          # weight (resident)
                pl.BlockSpec((N, Cout, 1), lambda b: (0, 0, 0)),      # scale (resident)
                pl.BlockSpec((N, Cout, 1), lambda b: (0, 0, 0)),      # bias (resident)
            ],
            out_specs=pl.BlockSpec((b_blk, Cout, P), lambda b: (b, 0, 0)),
        ),
        compiler_params=pltpu.CompilerParams(
            dimension_semantics=("parallel",),
            vmem_limit_bytes=48 << 20,     # budget inside v7x's 64 MiB physical VMEM
        ),
        cost_estimate=cost,
    )(patches, w_t, scale3, bias3)

    # (N, Cout, P) reshapes directly to NCHW — no transpose needed
    return out_t.reshape(N, Cout, Ho, Wo)
    # TODO(synk): for large H/W/Cin, move the im2col into the kernel (DMA an input tile
    # per step and build the 12 masked-tap rows from VMEM slices / 12 shifted matmuls)
    # to remove the remaining ~12x HBM read amplification of the wrapper-side im2col.


def masked_cconv_forward(x_nchw, weight_oihw, mask_kk, conv_bias,
                         scale_w, bias_w, lmda_idx, *, lmda_depth):
    """Forward pass of MaskedCConv (valid conv, stride 1). Returns NCHW output."""
    mask_np = np.asarray(mask_kk)          # the mask is a fixed constant -> treat static
    K = int(mask_np.shape[0])
    taps = tuple((kh, kw, float(mask_np[kh, kw]))
                 for kh in range(K) for kw in range(K) if mask_np[kh, kw] != 0)
    return _masked_cconv_jit(x_nchw, weight_oihw, conv_bias, scale_w, bias_w,
                             lmda_idx, taps=taps, lmda_depth=lmda_depth)


# --------------------------- pure-JAX reference --------------------------------
def ref_forward(x_nchw, weight_oihw, mask_kk, conv_bias, scale_w, bias_w,
                lmda_idx, lmda_depth):
    w = weight_oihw * jnp.asarray(mask_kk, dtype=weight_oihw.dtype)[None, None, :, :]
    conv = jax.lax.conv_general_dilated(
        x_nchw, w, window_strides=(1, 1), padding="VALID",
        dimension_numbers=("NCHW", "OIHW", "NCHW"))
    conv = conv + conv_bias[None, :, None, None]
    onehot = jax.nn.one_hot(lmda_idx[:, 0], lmda_depth, dtype=x_nchw.dtype)
    scale = jax.nn.softplus(onehot @ scale_w.T)[:, :, None, None]
    bias = (onehot @ bias_w.T)[:, :, None, None]
    return scale * conv + bias


# --------------------------------- main ----------------------------------------
if __name__ == "__main__":
    # small shapes consistent with the module defaults (stride=1, padding=0, bias=True)
    N, Cin, H, W = 2, 4, 16, 16
    Cout, K = 8, 5
    LMDA_DEPTH = 4

    key = jax.random.PRNGKey(0)
    k_x, k_w, k_cb, k_sw, k_bw = jax.random.split(key, 5)

    x = jax.random.normal(k_x, (N, Cin, H, W), dtype=jnp.float32)
    weight = 0.1 * jax.random.normal(k_w, (Cout, Cin, K, K), dtype=jnp.float32)
    conv_bias = 0.1 * jax.random.normal(k_cb, (Cout,), dtype=jnp.float32)
    scale_w = 0.1 * jax.random.normal(k_sw, (Cout, LMDA_DEPTH), dtype=jnp.float32)
    bias_w = 0.1 * jax.random.normal(k_bw, (Cout, LMDA_DEPTH), dtype=jnp.float32)

    # the fixed causal mask from MaskedCConv.__init__ (5x5, 12 nonzero taps)
    mask = np.array([[1, 1, 1, 1, 1],
                     [1, 1, 1, 1, 1],
                     [1, 1, 0, 0, 0],
                     [0, 0, 0, 0, 0],
                     [0, 0, 0, 0, 0]], dtype=np.float32)

    lmda_idx = jnp.array([[1], [3]], dtype=jnp.int32)  # (N, 1)

    out = masked_cconv_forward(x, weight, mask, conv_bias, scale_w, bias_w,
                               lmda_idx, lmda_depth=LMDA_DEPTH)
    out = jax.block_until_ready(out)

    ref = ref_forward(x, weight, mask, conv_bias, scale_w, bias_w,
                      lmda_idx, LMDA_DEPTH)
    np.testing.assert_allclose(np.asarray(out), np.asarray(ref),
                               rtol=1e-4, atol=1e-4)
    print("KERNEL_OK")
</pallas_src>

<mosaic_0001>
module attributes {stable_mosaic.version = 11 : i64} {
  func.func @masked_cconv_kernel(%arg0: i32, %arg1: memref<1x48x144xf32, #tpu.memory_space<vmem>>, %arg2: memref<8x48xf32, #tpu.memory_space<vmem>>, %arg3: memref<2x8x1xf32, #tpu.memory_space<vmem>>, %arg4: memref<2x8x1xf32, #tpu.memory_space<vmem>>, %arg5: memref<1x8x144xf32, #tpu.memory_space<vmem>>) attributes {dimension_semantics = [#tpu.dimension_semantics<parallel>], iteration_bounds = array<i64: 2>, scalar_prefetch = 0 : i64, scratch_operands = 0 : i64, tpu.core_type = #tpu.core_type<tc>, window_params = [{transform_indices = @transform_0, window_bounds = array<i64: 1, 48, 144>}, {pipeline_mode = #tpu.pipeline_mode<synchronous>, transform_indices = @transform_1, window_bounds = array<i64: 8, 48>}, {pipeline_mode = #tpu.pipeline_mode<synchronous>, transform_indices = @transform_2, window_bounds = array<i64: 2, 8, 1>}, {pipeline_mode = #tpu.pipeline_mode<synchronous>, transform_indices = @transform_3, window_bounds = array<i64: 2, 8, 1>}, {transform_indices = @transform_4, window_bounds = array<i64: 1, 8, 144>}]} {
    %c1_i32 = arith.constant 1 : i32
    %0 = arith.muli %arg0, %c1_i32 : i32
    %c0 = arith.constant 0 : index
    %c0_0 = arith.constant 0 : index
    %1 = vector.load %arg2[%c0, %c0_0] : memref<8x48xf32, #tpu.memory_space<vmem>>, vector<8x48xf32>
    %c0_1 = arith.constant 0 : index
    %c0_2 = arith.constant 0 : index
    %c0_3 = arith.constant 0 : index
    %2 = vector.load %arg1[%c0_1, %c0_2, %c0_3] : memref<1x48x144xf32, #tpu.memory_space<vmem>>, vector<1x48x144xf32>
    %3 = vector.shape_cast %2 : vector<1x48x144xf32> to vector<48x144xf32>
    %cst = arith.constant dense<0.000000e+00> : vector<8x144xf32>
    %4 = tpu.matmul %1, %3, %cst {dimension_numbers = #tpu.dot_dimension_numbers<[1], [0], [0], [1], [0, 0, 1, 1], [], []>} : vector<8x48xf32>, vector<48x144xf32>, vector<8x144xf32> -> vector<8x144xf32>
    %c0_i32 = arith.constant 0 : i32
    %5 = arith.addi %0, %c0_i32 : i32
    %6 = arith.index_cast %5 : i32 to index
    %c0_4 = arith.constant 0 : index
    %c0_5 = arith.constant 0 : index
    %7 = vector.load %arg3[%6, %c0_4, %c0_5] : memref<2x8x1xf32, #tpu.memory_space<vmem>>, vector<1x8x1xf32>
    %8 = vector.shape_cast %7 : vector<1x8x1xf32> to vector<8x1xf32>
    %c0_i32_6 = arith.constant 0 : i32
    %9 = arith.addi %0, %c0_i32_6 : i32
    %10 = arith.index_cast %9 : i32 to index
    %c0_7 = arith.constant 0 : index
    %c0_8 = arith.constant 0 : index
    %11 = vector.load %arg4[%10, %c0_7, %c0_8] : memref<2x8x1xf32, #tpu.memory_space<vmem>>, vector<1x8x1xf32>
    %12 = vector.shape_cast %11 : vector<1x8x1xf32> to vector<8x1xf32>
    %13 = vector.broadcast %8 : vector<8x1xf32> to vector<8x144xf32>
    %14 = arith.mulf %13, %4 : vector<8x144xf32>
    %15 = vector.broadcast %12 : vector<8x1xf32> to vector<8x144xf32>
    %16 = arith.addf %14, %15 : vector<8x144xf32>
    %c0_9 = arith.constant 0 : index
    %c0_10 = arith.constant 0 : index
    %c0_11 = arith.constant 0 : index
    %17 = vector.load %arg5[%c0_9, %c0_10, %c0_11] : memref<1x8x144xf32, #tpu.memory_space<vmem>>, vector<1x8x144xf32>
    %18 = vector.shape_cast %17 : vector<1x8x144xf32> to vector<8x144xf32>
    %19 = vector.shape_cast %16 : vector<8x144xf32> to vector<1x8x144xf32>
    tpu.vector_store %arg5[%c0_9, %c0_10, %c0_11], %19 {strides = array<i32>} : memref<1x8x144xf32, #tpu.memory_space<vmem>>, vector<1x8x144xf32>,
    return
  }
  func.func @transform_0(%arg0: i32) -> (i32, i32, i32) {
    %c0_i32 = arith.constant 0 : i32
    %c0_i32_0 = arith.constant 0 : i32
    %c0_i32_1 = arith.constant 0 : i32
    return %arg0, %c0_i32, %c0_i32_0 : i32, i32, i32
  }
  func.func @transform_1(%arg0: i32) -> (i32, i32) {
    %c0_i32 = arith.constant 0 : i32
    %c0_i32_0 = arith.constant 0 : i32
    %c0_i32_1 = arith.constant 0 : i32
    return %c0_i32, %c0_i32_0 : i32, i32
  }
  func.func @transform_2(%arg0: i32) -> (i32, i32, i32) {
    %c0_i32 = arith.constant 0 : i32
    %c0_i32_0 = arith.constant 0 : i32
    %c0_i32_1 = arith.constant 0 : i32
    %c0_i32_2 = arith.constant 0 : i32
    return %c0_i32, %c0_i32_0, %c0_i32_1 : i32, i32, i32
  }
  func.func @transform_3(%arg0: i32) -> (i32, i32, i32) {
    %c0_i32 = arith.constant 0 : i32
    %c0_i32_0 = arith.constant 0 : i32
    %c0_i32_1 = arith.constant 0 : i32
    %c0_i32_2 = arith.constant 0 : i32
    return %c0_i32, %c0_i32_0, %c0_i32_1 : i32, i32, i32
  }
  func.func @transform_4(%arg0: i32) -> (i32, i32, i32) {
    %c0_i32 = arith.constant 0 : i32
    %c0_i32_0 = arith.constant 0 : i32
    %c0_i32_1 = arith.constant 0 : i32
    return %arg0, %c0_i32, %c0_i32_0 : i32, i32, i32
  }
}

</mosaic_0001>

<bundles_post_ra>
// kernel: _masked_cconv_jit.1
= control target key start
LH: loop header
LB: loop body
LE: loop exit
PB: predicated region body
PF: predicated region fallthrough
CT: control target
= control target key end

     0   :  { %s395_s15 = smov 0   ;;  %s425_s0 = inlined_call_operand.vmem [shape: f32[2,48,144], index: 0, kind: input, shape index: {}]   ;;  %s426_s1 = inlined_call_operand.vmem [shape: f32[8,48], index: 1, kind: input, shape index: {}]   ;;  %s427_s2 = inlined_call_operand.vmem [shape: f32[2,8,1], index: 2, kind: input, shape index: {}]   ;;  %s428_s3 = inlined_call_operand.vmem [shape: f32[2,8,1], index: 3, kind: input, shape index: {}]   ;;  %s429_s4 = inlined_call_operand.vmem [shape: f32[2,8,144], index: 4, kind: output, shape index: {}]  }
   0x1 LB: > { %s336_s16 = sadd.s32 4294967295, %s367_s15   ;;  %p340_p0 = scmp.ge.s32.totalorder %s367_s15, 1  ;;  %s367_s15 = sphi %s395_s15, %s14_s15  }
   0x2   : > { %p162_p1 = scmp.lt.s32.totalorder %s367_s15, 3 }
   0x4   : > { %p163_p2 = pnand %p340_p0, %p162_p1 }
   0x5   : > { %p188_p3 = scmp.lt.s32.totalorder (!%p163_p2), %s336_s16, 1  ;;  %s346_s17 = sshll.u32 (!%p163_p2), %s336_s16, 3 }
   0x6   : > { %166 = sbr.rel (%p163_p2) target bundleno = 159 (0x9f), region = 36  ;;  %s256_s20 = scalar_lea.vmem (!%p163_p2), %s427_s2, %s346_s17 }
   0x7   : > { %s258_s24 = scalar_lea.vmem (!%p163_p2), %s428_s3, %s346_s17 }
   0xb   : > { %v369_v0 = vmov 0   ;;  %s431_s16 = smov (!%p188_p3, %s336_s16), 1  ;;  %v257_v1 = vld [vmem:[%s256_s20] sm:$0xff]  ;;  %vm211_vm0 = vcmask 392192   ;;  %vm275_vm1 = vcmask 130048  }
   0xc   : > { %360 = vset.pattern.permute.xlu0 %v369_v0  ;;  %s350_s21 = smul.u32 96, %s431_s16  ;;  %v259_v6 = vld [vmem:[%s258_s24] sm:$0xff]  ;;  %s349_s30 = sshll.u32 %s431_s16, 4 }
   0xd   : > { %262 = vperm.xlu0 %360, %v257_v1   ;;  %v198_v15 = vld [vmem:[%s426_s1] sm:$0xff]  ;;  %s197_s7 = scalar_lea.vmem %s429_s4, %s349_s30 }
   0xe   : > { %s192_s27 = scalar_lea.vmem %s425_s0, %s350_s21 }
   0xf   : > { %v209_v2 = vld [vmem:[%s192_s27 + $0x50] sm:$0xff]  ;;  %v210_v3 = vld [vmem:[%s192_s27 + $0x58] sm:$0xff]  ;;  %v207_v4 = vld [vmem:[%s192_s27 + $0x40] sm:$0xff] }
  0x10   : > { %225 = vmatpush.msra.mxu0 %v209_v2  ;;  %245 = vmatpush.msra.mxu1 %v210_v3  ;;  %v208_v5 = vld [vmem:[%s192_s27 + $0x48] sm:$0xff]  ;;  %v205_v7 = vld [vmem:[%s192_s27 + $0x30] sm:$0xff]  ;;  %v206_v8 = vld [vmem:[%s192_s27 + $0x38] sm:$0xff] }
  0x11   : > { %v203_v9 = vld [vmem:[%s192_s27 + $0x20] sm:$0xff]  ;;  %v204_v10 = vld [vmem:[%s192_s27 + $0x28] sm:$0xff]  ;;  %v201_v11 = vld [vmem:[%s192_s27 + $0x10] sm:$0xff] }
  0x12   : > { %226 = vmatpush.msra.mxu0 %v207_v4  ;;  %246 = vmatpush.msra.mxu1 %v208_v5  ;;  %v202_v12 = vld [vmem:[%s192_s27 + $0x18] sm:$0xff]  ;;  %v199_v13 = vld [vmem:[%s192_s27] sm:$0xff]  ;;  %v200_v14 = vld [vmem:[%s192_s27 + $0x8] sm:$0xff] }
  0x14   : > { %227 = vmatpush.msra.mxu0 %v205_v7  ;;  %247 = vmatpush.msra.mxu1 %v206_v8 }
  0x15   : > { %269 = vperm.xlu0 %360, %v259_v6  }
  0x16   : > { %228 = vmatpush.msra.mxu0 %v203_v9  ;;  %248 = vmatpush.msra.mxu1 %v204_v10 }
  0x18   : > { %229 = vmatpush.msra.mxu0 %v201_v11  ;;  %249 = vmatpush.msra.mxu1 %v202_v12 }
  0x1a   : > { %230 = vmatpush.msra.mxu0 %v199_v13  ;;  %250 = vmatpush.msra.mxu1 %v200_v14 }
  0x1b   : > { %344 = vmatmul.msk.f32.vlgmr.msra.gmra.mxu0 %vm211_vm0, %v198_v15  ;;  %345 = vmatmul.msk.f32.vlgmr.msra.gmra.mxu1 %vm211_vm0, %v198_v15 }
  0x7f   : > { %v263_v16 = vpop.permute.xlu0 %262 }
  0x87   : > { %v270_v21 = vpop.permute.xlu0 %269 }
  0x98   : > { %v232_v17 = vpop.f32.mrf.mxu0  ;;  %v252_v18 = vpop.f32.mrf.mxu1 }
  0x99   : > { %v265_v19 = vmul.f32 %v263_v16, %v232_v17  ;;  %v266_v20 = vmul.f32 %v263_v16, %v252_v18 }
  0x9b   : > { %v272_v22 = vadd.f32 %v270_v21, %v265_v19  ;;  %v273_v23 = vadd.f32 %v270_v21, %v266_v20 }
  0x9d   : > { %274 = vst [vmem:[%s197_s7] sm:$0xff] %v272_v22 }
  0x9e   : > { %276 = vst.msk [vmem:[%s197_s7 + $0x8] sm:$0xff] %vm275_vm1, %v273_v23 }
  0x9f PF: > { %s14_s15 = sadd.s32 1, %s367_s15  }
  0xa0   : > { %p11_p4 = scmp.ge.s32.totalorder %s14_s15, 4  }
  0xa2   :  { %13 = sbr.rel (!%p11_p4) target bundleno = 1 (0x1), region = 68 }

</bundles_post_ra>
